<compile_context>
chip_gen: v6e
topology: v6e:2x2x1
jax: 0.10.0
libtpu: 0.0.40
codegen_flags: <defaults>
</compile_context>

<pallas_src>
from math import sqrt

import jax
import jax.numpy as jnp
import numpy as np
from jax.experimental import pallas as pl
from jax.experimental.pallas import tpu as pltpu


def _round_up(x, m):
    return (x + m - 1) // m * m


def _cdiv(a, b):
    return -(-a // b)


def fused_upsample_1d(x_ncl, weight, bias, pad, *, tile_rows=None):
    """FusedUpsample forward.

    x_ncl  : (N, Cin, L) float32 (PyTorch NCL layout)
    weight : (Cin, Cout, K)
    bias   : (Cout,)
    pad    : conv_transpose1d padding
    returns: (N, Cout, Lout), Lout = (L-1)*2 - 2*pad + K + 1
    """
    N, Cin, L = map(int, x_ncl.shape)
    Cin_w, Cout, K = map(int, weight.shape)
    assert Cin == Cin_w

    out_dtype = x_ncl.dtype
    out_bytes = jnp.dtype(out_dtype).itemsize

    # ---- parameter prep (tiny, matches PyTorch forward exactly) -----------------
    K_eff = K + 1
    multiplier = sqrt(2.0 / (Cin * K * K))
    w = weight.astype(jnp.float32) * multiplier
    wp = jnp.pad(w, ((0, 0), (0, 0), (1, 1)))                # F.pad(..., [1, 1])
    w_eff = (wp[:, :, 1:] + wp[:, :, :-1]) * 0.5             # (Cin, Cout, K_eff)
    w_flip = jnp.flip(w_eff, axis=2)                         # conv-view (flipped taps)

    assert 0 <= pad <= K_eff - 1, "padding larger than effective kernel not supported"
    P = K_eff - 1 - pad
    Lout = (L - 1) * 2 - 2 * pad + K_eff
    Lhalf = (Lout + 1) // 2                                  # number of (even,odd) output pairs

    # ---- polyphase decomposition (all static Python ints) -----------------------
    # out[2j + r] = sum_m sum_ci x[j + d0[r] + m, ci] * w_flip[ci, :, s[r] + 2m]
    s = [(P + r) % 2 for r in range(2)]
    T = [(K_eff - s[r] + 1) // 2 for r in range(2)]          # taps per phase
    d0 = [(r + s[r] - P) // 2 for r in range(2)]             # first input offset per phase
    d_min = min(d0)
    d_max = max(d0[r] + T[r] - 1 for r in range(2))
    W = d_max - d_min + 1                                    # union input window (rows)

    C2 = 2 * Cout

    # Per-tap fused weight: Wtap[d] is (Cin, 2*Cout), phase-0 taps in cols [0:Cout],
    # phase-1 taps in cols [Cout:2*Cout]; rows outside a phase's tap range stay zero.
    wtap = jnp.zeros((W, Cin, C2), jnp.float32)
    for r in range(2):
        for m in range(T[r]):
            d = d0[r] + m - d_min
            k = s[r] + 2 * m
            wtap = wtap.at[d, :, r * Cout:(r + 1) * Cout].set(w_flip[:, :, k])
    wtap = wtap.astype(jnp.bfloat16)                          # bf16 MXU operand
    bias2 = jnp.tile(bias.astype(jnp.float32), 2).reshape(1, C2)

    # ---- per-generation VMEM cap -------------------------------------------------
    try:
        phys_vmem = int(pltpu.get_tpu_info().vmem_capacity_bytes)
    except Exception:
        phys_vmem = 64 << 20                                  # conservative (v7x)
    cap_bytes = max(32 << 20, min(phys_vmem - (16 << 20), 112 << 20))

    def est_vmem(tj):
        nt = _cdiv(Lhalf, tj)
        lp = nt * tj + W - 1
        return (2 * lp * Cin * 4            # resident f32 input (2 buffers)
                + 2 * tj * C2 * out_bytes   # output tile (2 buffers)
                + 2 * W * Cin * C2 * 2      # bf16 fused weights (2 buffers)
                + 2 * C2 * 4)               # bias

    # ---- tiling: ~4 MiB output tile budget, 256-row aligned ----------------------
    if tile_rows is None:
        tj_cap = max(256, _round_up((4 << 20) // (out_bytes * C2), 256))
        TJ = _round_up(Lhalf, 8) if Lhalf <= tj_cap else tj_cap
        while TJ > 256 and est_vmem(TJ) > cap_bytes:
            TJ = max(256, _round_up(TJ // 2, 256))
    else:
        TJ = max(8, _round_up(int(tile_rows), 8))
    NT = _cdiv(Lhalf, TJ)
    Lpad_rows = NT * TJ + W - 1

    # halo-padded channels-last input: x_pad[n, p, ci] = x[n, ci, p + d_min] (0 outside)
    # built with one fused transpose + pad copy.
    left = max(0, -d_min)
    right = max(0, Lpad_rows - left - L)
    x_nlc = jnp.transpose(x_ncl.astype(jnp.float32), (0, 2, 1))        # (N, L, Cin)
    x_pad = jnp.pad(x_nlc, ((0, 0), (left, right), (0, 0)))[:, :Lpad_rows, :]

    # ---- Pallas kernel ------------------------------------------------------------
    def kernel(x_ref, w_ref, b_ref, o_ref):
        # x_ref : (Lpad_rows, Cin) f32   resident input rows for this batch element
        # w_ref : (W, Cin, 2*Cout) bf16  per-tap fused weights (resident)
        # b_ref : (1, 2*Cout) f32
        # o_ref : (TJ, 2*Cout)           one output tile: [phase0 cols | phase1 cols]
        jt = pl.program_id(1)
        row0 = pl.multiple_of(jt * TJ, 8)
        # W per-tap accumulated matmuls; taps folded for both phases into each Wtap[d].
        acc = jax.lax.dot_general(
            x_ref[pl.ds(row0, TJ), :].astype(jnp.bfloat16), w_ref[0],
            dimension_numbers=(((1,), (0,)), ((), ())),
            preferred_element_type=jnp.float32)               # (TJ, 2*Cout)
        for d in range(1, W):                                  # W is tiny -> static unroll
            acc = acc + jax.lax.dot_general(
                x_ref[pl.ds(row0 + d, TJ), :].astype(jnp.bfloat16), w_ref[d],
                dimension_numbers=(((1,), (0,)), ((), ())),
                preferred_element_type=jnp.float32)
        # single full-width store, bias added once
        o_ref[...] = (acc + b_ref[...]).astype(o_ref.dtype)

    est = est_vmem(TJ)
    vmem_limit = int(min(max(est + (4 << 20), 32 << 20), cap_bytes))

    out_pad = pl.pallas_call(
        kernel,
        out_shape=jax.ShapeDtypeStruct((N, NT * TJ, C2), out_dtype),
        grid_spec=pltpu.PrefetchScalarGridSpec(
            num_scalar_prefetch=0,
            grid=(N, NT),
            in_specs=[
                pl.BlockSpec((None, Lpad_rows, Cin), lambda n, j: (n, 0, 0)),
                pl.BlockSpec((W, Cin, C2), lambda n, j: (0, 0, 0)),
                pl.BlockSpec((1, C2), lambda n, j: (0, 0)),
            ],
            out_specs=pl.BlockSpec((None, TJ, C2), lambda n, j: (n, j, 0)),
        ),
        compiler_params=pltpu.CompilerParams(
            # x's block index is constant in j: keep j off the second TensorCore (v7x)
            # so the resident input isn't DMA'd twice; batch stays parallel.
            dimension_semantics=("parallel", "arbitrary"),
            vmem_limit_bytes=vmem_limit),
    )(x_pad, wtap, bias2)

    # (N, NT*TJ, 2*Cout) is memory-identical to (N, 2*NT*TJ, Cout) with the two phases
    # interleaved along length -> the reshape is free; crop and return to NCL
    # (one output transpose pass, fused with the crop).
    out_nlc = out_pad.reshape(N, NT * TJ * 2, Cout)[:, :Lout, :]
    return jnp.transpose(out_nlc, (0, 2, 1))                  # (N, Cout, Lout)


def _reference(x_ncl, weight, bias, pad):
    """Direct conv_transpose1d reference (pure JAX, f32, no Pallas)."""
    N, Cin, L = x_ncl.shape
    _, Cout, K = weight.shape
    multiplier = sqrt(2.0 / (Cin * K * K))
    w = weight * multiplier
    wp = jnp.pad(w, ((0, 0), (0, 0), (1, 1)))
    w_eff = (wp[:, :, 1:] + wp[:, :, :-1]) / 2.0             # (Cin, Cout, K_eff)
    K_eff = K + 1
    Lfull = (L - 1) * 2 + K_eff
    out = jnp.zeros((N, Cout, Lfull), jnp.float32)
    for i in range(L):
        for k in range(K_eff):
            out = out.at[:, :, 2 * i + k].add(
                jnp.einsum('nc,cd->nd', x_ncl[:, :, i], w_eff[:, :, k]))
    out = out[:, :, pad:Lfull - pad] if pad > 0 else out
    return out + bias[None, :, None]


if __name__ == "__main__":
    key = jax.random.PRNGKey(0)

    configs = [
        # (N, Cin, Cout, L, K, pad, tile_rows)
        (2, 4, 4, 16, 3, 1, None),   # module-like demo shape, single tile
        (2, 4, 4, 16, 3, 1, 8),      # same, forced multi-tile (exercises halo handling)
        (2, 8, 6, 24, 4, 1, 8),      # even kernel -> odd Lout, unequal phase tap counts
    ]
    for (N, Cin, Cout, L, K, pad, tile_rows) in configs:
        k_x, k_w, key = jax.random.split(key, 3)
        x = jax.random.normal(k_x, (N, Cin, L), dtype=jnp.float32)
        weight = jax.random.normal(k_w, (Cin, Cout, K), dtype=jnp.float32)  # torch.randn analogue
        bias = jnp.zeros((Cout,), dtype=jnp.float32)                        # torch.zeros analogue

        out = fused_upsample_1d(x, weight, bias, pad, tile_rows=tile_rows)
        out = jax.block_until_ready(out)

        ref = _reference(x, weight, bias, pad)
        # bf16 MXU operands with f32 accumulation -> relaxed tolerance vs f32 reference
        np.testing.assert_allclose(np.asarray(out), np.asarray(ref), rtol=2e-2, atol=2e-2)

    print("KERNEL_OK")
</pallas_src>

<mosaic_0001>
module attributes {stable_mosaic.version = 11 : i64} {
  func.func @kernel(%arg0: i32, %arg1: i32, %arg2: memref<1x18x4xf32, #tpu.memory_space<vmem>>, %arg3: memref<3x4x8xbf16, #tpu.memory_space<vmem>>, %arg4: memref<1x8xf32, #tpu.memory_space<vmem>>, %arg5: memref<1x16x8xf32, #tpu.memory_space<vmem>>) attributes {dimension_semantics = [#tpu.dimension_semantics<parallel>, #tpu.dimension_semantics<arbitrary>], iteration_bounds = array<i64: 2, 1>, scalar_prefetch = 0 : i64, scratch_operands = 0 : i64, tpu.core_type = #tpu.core_type<tc>, window_params = [{transform_indices = @transform_0, window_bounds = array<i64: 1, 18, 4>}, {pipeline_mode = #tpu.pipeline_mode<synchronous>, transform_indices = @transform_1, window_bounds = array<i64: 3, 4, 8>}, {pipeline_mode = #tpu.pipeline_mode<synchronous>, transform_indices = @transform_2, window_bounds = array<i64: 1, 8>}, {transform_indices = @transform_3, window_bounds = array<i64: 1, 16, 8>}]} {
    %c16_i32 = arith.constant 16 : i32
    %0 = arith.muli %arg1, %c16_i32 : i32
    %1 = tpu.assume_multiple %0, 8 : i32
    %c0 = arith.constant 0 : index
    %2 = arith.index_cast %1 : i32 to index
    %c0_0 = arith.constant 0 : index
    %3 = vector.load %arg2[%c0, %2, %c0_0] : memref<1x18x4xf32, #tpu.memory_space<vmem>>, vector<1x16x4xf32>
    %4 = vector.shape_cast %3 : vector<1x16x4xf32> to vector<16x4xf32>
    %5 = arith.truncf %4 : vector<16x4xf32> to vector<16x4xbf16>
    %c0_1 = arith.constant 0 : index
    %c0_2 = arith.constant 0 : index
    %c0_3 = arith.constant 0 : index
    %6 = vector.load %arg3[%c0_1, %c0_2, %c0_3] : memref<3x4x8xbf16, #tpu.memory_space<vmem>>, vector<1x4x8xbf16>
    %7 = vector.shape_cast %6 : vector<1x4x8xbf16> to vector<4x8xbf16>
    %cst = arith.constant dense<0.000000e+00> : vector<16x8xf32>
    %8 = tpu.matmul %5, %7, %cst {dimension_numbers = #tpu.dot_dimension_numbers<[1], [0], [0], [1], [0, 0, 1, 1], [], []>} : vector<16x4xbf16>, vector<4x8xbf16>, vector<16x8xf32> -> vector<16x8xf32>
    %c1_i32 = arith.constant 1 : i32
    %9 = arith.addi %1, %c1_i32 : i32
    %c0_4 = arith.constant 0 : index
    %10 = arith.index_cast %9 : i32 to index
    %c0_5 = arith.constant 0 : index
    %11 = vector.load %arg2[%c0_4, %10, %c0_5] : memref<1x18x4xf32, #tpu.memory_space<vmem>>, vector<1x16x4xf32>
    %12 = vector.shape_cast %11 : vector<1x16x4xf32> to vector<16x4xf32>
    %13 = arith.truncf %12 : vector<16x4xf32> to vector<16x4xbf16>
    %c1 = arith.constant 1 : index
    %c0_6 = arith.constant 0 : index
    %c0_7 = arith.constant 0 : index
    %14 = vector.load %arg3[%c1, %c0_6, %c0_7] : memref<3x4x8xbf16, #tpu.memory_space<vmem>>, vector<1x4x8xbf16>
    %15 = vector.shape_cast %14 : vector<1x4x8xbf16> to vector<4x8xbf16>
    %cst_8 = arith.constant dense<0.000000e+00> : vector<16x8xf32>
    %16 = tpu.matmul %13, %15, %cst_8 {dimension_numbers = #tpu.dot_dimension_numbers<[1], [0], [0], [1], [0, 0, 1, 1], [], []>} : vector<16x4xbf16>, vector<4x8xbf16>, vector<16x8xf32> -> vector<16x8xf32>
    %17 = arith.addf %8, %16 : vector<16x8xf32>
    %c2_i32 = arith.constant 2 : i32
    %18 = arith.addi %1, %c2_i32 : i32
    %c0_9 = arith.constant 0 : index
    %19 = arith.index_cast %18 : i32 to index
    %c0_10 = arith.constant 0 : index
    %20 = vector.load %arg2[%c0_9, %19, %c0_10] : memref<1x18x4xf32, #tpu.memory_space<vmem>>, vector<1x16x4xf32>
    %21 = vector.shape_cast %20 : vector<1x16x4xf32> to vector<16x4xf32>
    %22 = arith.truncf %21 : vector<16x4xf32> to vector<16x4xbf16>
    %c2 = arith.constant 2 : index
    %c0_11 = arith.constant 0 : index
    %c0_12 = arith.constant 0 : index
    %23 = vector.load %arg3[%c2, %c0_11, %c0_12] : memref<3x4x8xbf16, #tpu.memory_space<vmem>>, vector<1x4x8xbf16>
    %24 = vector.shape_cast %23 : vector<1x4x8xbf16> to vector<4x8xbf16>
    %cst_13 = arith.constant dense<0.000000e+00> : vector<16x8xf32>
    %25 = tpu.matmul %22, %24, %cst_13 {dimension_numbers = #tpu.dot_dimension_numbers<[1], [0], [0], [1], [0, 0, 1, 1], [], []>} : vector<16x4xbf16>, vector<4x8xbf16>, vector<16x8xf32> -> vector<16x8xf32>
    %26 = arith.addf %17, %25 : vector<16x8xf32>
    %c0_14 = arith.constant 0 : index
    %c0_15 = arith.constant 0 : index
    %27 = vector.load %arg4[%c0_14, %c0_15] : memref<1x8xf32, #tpu.memory_space<vmem>>, vector<1x8xf32>
    %28 = vector.broadcast %27 : vector<1x8xf32> to vector<16x8xf32>
    %29 = arith.addf %26, %28 : vector<16x8xf32>
    %c0_16 = arith.constant 0 : index
    %c0_17 = arith.constant 0 : index
    %c0_18 = arith.constant 0 : index
    %30 = vector.load %arg5[%c0_16, %c0_17, %c0_18] : memref<1x16x8xf32, #tpu.memory_space<vmem>>, vector<1x16x8xf32>
    %31 = vector.shape_cast %30 : vector<1x16x8xf32> to vector<16x8xf32>
    %32 = vector.shape_cast %29 : vector<16x8xf32> to vector<1x16x8xf32>
    tpu.vector_store %arg5[%c0_16, %c0_17, %c0_18], %32 {strides = array<i32>} : memref<1x16x8xf32, #tpu.memory_space<vmem>>, vector<1x16x8xf32>,
    return
  }
  func.func @transform_0(%arg0: i32, %arg1: i32) -> (i32, i32, i32) {
    %c0_i32 = arith.constant 0 : i32
    %c0_i32_0 = arith.constant 0 : i32
    %c0_i32_1 = arith.constant 0 : i32
    return %arg0, %c0_i32, %c0_i32_0 : i32, i32, i32
  }
  func.func @transform_1(%arg0: i32, %arg1: i32) -> (i32, i32, i32) {
    %c0_i32 = arith.constant 0 : i32
    %c0_i32_0 = arith.constant 0 : i32
    %c0_i32_1 = arith.constant 0 : i32
    %c0_i32_2 = arith.constant 0 : i32
    return %c0_i32, %c0_i32_0, %c0_i32_1 : i32, i32, i32
  }
  func.func @transform_2(%arg0: i32, %arg1: i32) -> (i32, i32) {
    %c0_i32 = arith.constant 0 : i32
    %c0_i32_0 = arith.constant 0 : i32
    %c0_i32_1 = arith.constant 0 : i32
    return %c0_i32, %c0_i32_0 : i32, i32
  }
  func.func @transform_3(%arg0: i32, %arg1: i32) -> (i32, i32, i32) {
    %c0_i32 = arith.constant 0 : i32
    %c0_i32_0 = arith.constant 0 : i32
    return %arg0, %arg1, %c0_i32 : i32, i32, i32
  }
}

</mosaic_0001>

<bundles_post_ra>
// kernel: tpu_custom_call.1
= control target key start
LH: loop header
LB: loop body
LE: loop exit
PB: predicated region body
PF: predicated region fallthrough
CT: control target
= control target key end

     0   :  { %s579_s12 = smov 0   ;;  %s581_s13 = smov 0   ;;  %s634_s0 = inlined_call_operand.vmem [shape: f32[2,18,4], index: 0, kind: input, shape index: {}]   ;;  %s635_s1 = inlined_call_operand.vmem [shape: bf16[3,4,8], index: 1, kind: input, shape index: {}]   ;;  %s636_s2 = inlined_call_operand.vmem [shape: f32[1,8], index: 2, kind: input, shape index: {}]   ;;  %s637_s3 = inlined_call_operand.vmem [shape: f32[2,16,8], index: 3, kind: output, shape index: {}]  }
   0x1   :  { %s583_s14 = smov 0  }
   0x2 LB: > { %s25_s15 = sadd.s32 1, %s551_s13  ;;  %p465_p0 = scmp.ge.s32.totalorder %s555_s14, 1  ;;  %s555_s14 = sphi %s583_s14, %s13_s14   ;;  %s551_s13 = sphi %s581_s13, %s639_s13   ;;  %s547_s12 = sphi %s579_s12, %s638_s12  }
   0x3   : > { %p27_p1 = scmp.ge.s32.totalorder %s25_s15, 2  ;;  %p151_p2 = scmp.lt.s32.totalorder %s555_s14, 3 }
   0x5   : > { %s641_s15 = smov (%p27_p1, %s25_s15), 0  ;;  %p152_p3 = pnand %p465_p0, %p151_p2 }
   0x6   : > { %p179_p4 = scmp.lt.s32.totalorder (!%p152_p3), %s547_s12, 1 }
   0x7   : > { %155 = sbr.rel (%p152_p3) target bundleno = 230 (0xe6), region = 32 }
   0xc   : > { %v471_v0 = vld [vmem:[%s635_s1 + $0x2] sm:$0x3]  ;;  %vm212_vm0 = vcmask 1041408   ;;  %v200_v1 = vld [vmem:[%s635_s1] sm:$0x3]  ;;  %v557_v2 = vmov 0.0  }
   0xd   : > { %488 = vmatprep.subr.bf16.mxu0 %v557_v2  ;;  %v214_v3 = vsel %vm212_vm0, %v471_v0, 0  ;;  %494 = vmatprep.subr.bf16.mxu1 %v557_v2  ;;  %v261_v4 = vsel %vm212_vm0, %v200_v1, 0  ;;  %vm558_vm1 = vmmov 0   ;;  %s643_s12 = smov (!%p179_p4, %s547_s12), 1  ;;  %v476_v5 = vld [vmem:[%s635_s1 + $0x4] sm:$0x3] }
   0xe   : > { %489 = vmatpush3.bf16.msra.mxu0 %v214_v3  ;;  %495 = vmatpush3.bf16.msra.mxu1 %v261_v4  ;;  %s506_s20 = smul.u32 24, %s643_s12  ;;  %vm208_vm2 = vcmask 31744   ;;  %v315_v11 = vsel %vm212_vm0, %v476_v5, 0  ;;  %s481_s26 = sshll.u32 %s643_s12, 4  ;;  %v478_v26 = vld [vmem:[%s636_s2] ss:$0 sm:$0xff] }
   0xf   : > { %490 = vmatprep.mubr.msk.bf16.mxu0 %vm558_vm1, %v557_v2  ;;  %496 = vmatprep.mubr.msk.bf16.mxu1 %vm558_vm1, %v557_v2  ;;  %s192_s4 = scalar_lea.vmem %s637_s3, %s481_s26  ;;  %vm369_vm3 = vcmask 64512  }
  0x10   : > { %500 = vmatprep.subr.bf16.mxu0 %v557_v2  ;;  %s183_s25 = scalar_lea.vmem %s634_s0, %s506_s20 }
  0x11   : > { %v469_v6 = vld [vmem:[%s183_s25 + $0x1] sm:$0xff]  ;;  %v470_v7 = vld [vmem:[%s183_s25 + $0x9] sm:$0xff] }
  0x12   : > { %v197_v8 = vld [vmem:[%s183_s25] sm:$0xff]  ;;  %v205_v9 = vpack.c.bf16 %v470_v7, %v469_v6  ;;  %v198_v10 = vld [vmem:[%s183_s25 + $0x8] sm:$0xff] }
  0x13   : > { %v199_v12 = vpack.c.bf16 %v198_v10, %v197_v8  ;;  %v474_v13 = vld [vmem:[%s183_s25 + $0x2] sm:$0xff]  ;;  %v475_v14 = vld [vmem:[%s183_s25 + $0xa] sm:$0xff] }
  0x14   : > { %491 = vmatmul.mubr.msk.bf16.vlgmr.msra.gmra.mxu0 %vm208_vm2, %v205_v9  ;;  %v308_v15 = vpack.c.bf16 %v475_v14, %v474_v13 }
  0x15   : > { %497 = vmatmul.mubr.msk.bf16.vlgmr.msra.gmra.mxu1 %vm208_vm2, %v199_v12  ;;  %501 = vmatpush3.bf16.msra.mxu0 %v315_v11 }
  0x16   : > { %502 = vmatprep.mubr.msk.bf16.mxu0 %vm558_vm1, %v557_v2 }
  0x1c   : > { %503 = vmatmul.mubr.msk.bf16.vlgmr.msra.gmra.mxu0 %vm208_vm2, %v308_v15 }
  0xd4   : > { %v250_v16 = vpop.f32.mrf.mxu0 }
  0xd5   : > { %v297_v17 = vpop.f32.mrf.mxu1 }
  0xd6   : > { %v492_v18 = vpop.f32.mrf.mxu0  ;;  %v298_v23 = vadd.f32 %v297_v17, %v250_v16 }
  0xd7   : > { %v498_v19 = vpop.f32.mrf.mxu1 }
  0xd8   : > { %v253_v20 = vpop.f32.mrf.mxu0 }
  0xd9   : > { %v300_v21 = vpop.f32.mrf.mxu1 }
  0xda   : > { %v493_v22 = vpop.f32.mrf.mxu0  ;;  %v301_v29 = vadd.f32 %v300_v21, %v253_v20 }
  0xdb   : > { %v499_v24 = vpop.f32.mrf.mxu1 }
  0xdc   : > { %v351_v25 = vpop.f32.mrf.mxu0 }
  0xdd   : > { %v358_v27 = vadd.f32 %v351_v25, %v298_v23 }
  0xde   : > { %v504_v28 = vpop.f32.mrf.mxu0 }
  0xdf   : > { %v367_v30 = vadd.f32 %v478_v26, %v358_v27 }
  0xe0   : > { %v354_v31 = vpop.f32.mrf.mxu0 }
  0xe1   : > { %370 = vst.msk [vmem:[%s192_s4] sm:$0xff] %vm369_vm3, %v367_v30  ;;  %v359_v32 = vadd.f32 %v354_v31, %v301_v29 }
  0xe2   : > { %v505_v33 = vpop.f32.mrf.mxu0 }
  0xe3   : > { %v368_v34 = vadd.f32 %v478_v26, %v359_v32 }
  0xe5   : > { %371 = vst.msk [vmem:[%s192_s4 + $0x8] sm:$0xff] %vm369_vm3, %v368_v34 }
  0xe6 PF: > { %s13_s14 = sadd.s32 1, %s555_s14   ;;  %s638_s12 = smov %s551_s13 }
  0xe7   : > { %p10_p5 = scmp.ge.s32.totalorder %s13_s14, 4   ;;  %s639_s13 = smov %s641_s15 }
  0xe9   :  { %12 = sbr.rel (!%p10_p5) target bundleno = 2 (0x2), region = 67 }

</bundles_post_ra>
